<compile_context>
chip_gen: v7x
topology: tpu7x:2x2x1
jax: 0.10.0
libtpu: 0.0.40
codegen_flags: <defaults>
</compile_context>

<pallas_src>
import functools

import jax
import jax.numpy as jnp
from jax.experimental import pallas as pl
from jax.experimental.pallas import tpu as pltpu


def _softplus(x):
    # Numerically stable softplus, matches torch.nn.Softplus (beta=1).
    return jnp.maximum(x, 0.0) + jnp.log1p(jnp.exp(-jnp.abs(x)))


def make_nnmodel_kernel(ndepths: int, with_skip: bool, use_bf16: bool):
    """Fused MLP kernel; activations are (features, batch_tile)."""

    def kernel(*refs):
        # arg order: x, (W0, b0), ..., (W_{d-1}, b_{d-1}), W_last,
        #            [conn, skip]  (SMEM, only if with_skip), out
        x_ref = refs[0]
        idx = 1
        Ws, bs = [], []
        for _ in range(ndepths):
            Ws.append(refs[idx])
            bs.append(refs[idx + 1])
            idx += 2
        w_last_ref = refs[idx]
        idx += 1
        if with_skip:
            conn_ref = refs[idx]
            skip_ref = refs[idx + 1]
            idx += 2
        out_ref = refs[idx]

        def mm(w, h):
            if use_bf16:
                w = w.astype(jnp.bfloat16)
                h = h.astype(jnp.bfloat16)
            return jnp.dot(w, h, preferred_element_type=jnp.float32)

        h = x_ref[...].astype(jnp.float32)            # (n_prev, tm)
        for i in range(ndepths):
            y = mm(Ws[i][...], h)                     # (nhid, tm), lane-dense N
            y = y + bs[i][...]                        # bias (nhid, 1) broadcasts over lanes
            y = _softplus(y)
            if with_skip and i >= 1:
                # conn/skip are Linear(1,1,bias=False) == scalar multipliers
                y = conn_ref[i - 1] * y + skip_ref[i - 1] * h
            h = y
        # final projection: (1, nhid) @ (nhid, tm) -> (1, tm)  (lane-dense store)
        out_ref[...] = mm(w_last_ref[...], h).astype(out_ref.dtype)

    return kernel


def nnmodel_forward(x, Ws, bs, w_last, conn=None, skip=None, *, tm=512,
                    use_bf16=False):
    """Run the fused NNModel forward pass with a single pallas_call.

    Args:
      x:      (B, ninp) input, row-major like the PyTorch module.
      Ws:     list of ndepths weights in PyTorch layout (out_features, in_features).
      bs:     list of ndepths biases, each shaped (nhid, 1).
      w_last: (1, nhid) final projection weight (no bias).
      conn, skip: optional (ndepths-1,) scalar skip-connection weights.
      tm:     batch tile (lane width); multiple of 128.

    Returns:
      (B, 1) output, matching the PyTorch forward.
    """
    B, ninp = x.shape
    ndepths = len(Ws)
    nhid = Ws[0].shape[0]
    with_skip = conn is not None
    assert tm % 128 == 0, "batch tile must be a multiple of 128 (lane width)"

    # Pad batch to a tile multiple; padded columns are independent garbage we slice off.
    grid_n = max(pl.cdiv(B, tm), 1)
    B_pad = grid_n * tm
    xt = jnp.pad(x.T, ((0, 0), (0, B_pad - B)))       # (ninp, B_pad), batch on lanes

    kernel = make_nnmodel_kernel(ndepths, with_skip, use_bf16)

    inputs = [xt]
    in_specs = [pl.BlockSpec((ninp, tm), lambda i: (0, i))]

    for W, b in zip(Ws, bs):
        inputs.append(W)
        in_specs.append(pl.BlockSpec(W.shape, lambda i: (0, 0)))
        inputs.append(b)
        in_specs.append(pl.BlockSpec(b.shape, lambda i: (0, 0)))

    inputs.append(w_last)
    in_specs.append(pl.BlockSpec(w_last.shape, lambda i: (0, 0)))

    if with_skip:
        inputs.append(conn)
        in_specs.append(pl.BlockSpec(memory_space=pltpu.MemorySpace.SMEM))
        inputs.append(skip)
        in_specs.append(pl.BlockSpec(memory_space=pltpu.MemorySpace.SMEM))

    out = pl.pallas_call(
        kernel,
        out_shape=jax.ShapeDtypeStruct((1, B_pad), x.dtype),
        grid_spec=pltpu.PrefetchScalarGridSpec(
            num_scalar_prefetch=0,
            grid=(grid_n,),
            in_specs=in_specs,
            out_specs=pl.BlockSpec((1, tm), lambda i: (0, i)),
        ),
        compiler_params=pltpu.CompilerParams(
            dimension_semantics=("parallel",),
        ),
    )(*inputs)

    # Back to the PyTorch output shape (B, 1).
    return out[0, :B].reshape(B, 1)


def ref_forward(x, Ws, bs, w_last, conn=None, skip=None):
    """Pure-JAX reference matching the PyTorch forward semantics.

    Weights in PyTorch layout (out, in); biases (nhid, 1); w_last (1, nhid).
    """
    with_skip = conn is not None
    h = x
    for i in range(len(Ws)):
        y = _softplus(h @ Ws[i].T + bs[i][:, 0])
        if with_skip and i >= 1:
            y = conn[i - 1] * y + skip[i - 1] * h
        h = y
    return h @ w_last.T


if __name__ == "__main__":
    # Config consistent with NNModel(ninp, nhid, ndepths, with_skip=True)
    ninp, nhid, ndepths = 8, 32, 3
    with_skip = True
    B = 600          # deliberately NOT a multiple of the tile -> exercises padding
    tm = 256         # lane-dense tile; grid = cdiv(600, 256) = 3 (>= 2 for megacore)

    key = jax.random.PRNGKey(0)
    keys = jax.random.split(key, 2 * ndepths + 4)

    Ws, bs = [], []
    kidx = 0
    for i in range(ndepths):
        n1 = ninp if i == 0 else nhid
        # PyTorch layout: (out_features, in_features)
        Ws.append(jax.random.normal(keys[kidx], (nhid, n1), jnp.float32) * 0.2)
        kidx += 1
        bs.append(jax.random.normal(keys[kidx], (nhid, 1), jnp.float32) * 0.1)
        kidx += 1
    w_last = jax.random.normal(keys[kidx], (1, nhid), jnp.float32) * 0.2
    kidx += 1

    if with_skip:
        conn = jax.random.normal(keys[kidx], (ndepths - 1,), jnp.float32) * 0.5
        kidx += 1
        skip = jax.random.normal(keys[kidx], (ndepths - 1,), jnp.float32) * 0.5
        kidx += 1
    else:
        conn = skip = None

    x = jax.random.normal(keys[kidx], (B, ninp), jnp.float32)

    out = nnmodel_forward(x, Ws, bs, w_last, conn, skip, tm=tm, use_bf16=False)
    out = jax.block_until_ready(out)

    expected = ref_forward(x, Ws, bs, w_last, conn, skip)
    assert out.shape == (B, 1), out.shape
    assert jnp.allclose(out, expected, atol=1e-5, rtol=1e-5), (
        float(jnp.max(jnp.abs(out - expected)))
    )
    print("KERNEL_OK")
</pallas_src>

<mosaic_0001>
module attributes {stable_mosaic.version = 11 : i64} {
  func.func @kernel(%arg0: i32, %arg1: memref<8x256xf32, #tpu.memory_space<vmem>>, %arg2: memref<32x8xf32, #tpu.memory_space<vmem>>, %arg3: memref<32x1xf32, #tpu.memory_space<vmem>>, %arg4: memref<32x32xf32, #tpu.memory_space<vmem>>, %arg5: memref<32x1xf32, #tpu.memory_space<vmem>>, %arg6: memref<32x32xf32, #tpu.memory_space<vmem>>, %arg7: memref<32x1xf32, #tpu.memory_space<vmem>>, %arg8: memref<1x32xf32, #tpu.memory_space<vmem>>, %arg9: memref<2xf32, #tpu.memory_space<smem>>, %arg10: memref<2xf32, #tpu.memory_space<smem>>, %arg11: memref<1x256xf32, #tpu.memory_space<vmem>>) attributes {dimension_semantics = [#tpu.dimension_semantics<parallel>], iteration_bounds = array<i64: 3>, scalar_prefetch = 0 : i64, scratch_operands = 0 : i64, tpu.core_type = #tpu.core_type<tc>, window_params = [{transform_indices = @transform_0, window_bounds = array<i64: 8, 256>}, {pipeline_mode = #tpu.pipeline_mode<synchronous>, transform_indices = @transform_1, window_bounds = array<i64: 32, 8>}, {pipeline_mode = #tpu.pipeline_mode<synchronous>, transform_indices = @transform_2, window_bounds = array<i64: 32, 1>}, {pipeline_mode = #tpu.pipeline_mode<synchronous>, transform_indices = @transform_3, window_bounds = array<i64: 32, 32>}, {pipeline_mode = #tpu.pipeline_mode<synchronous>, transform_indices = @transform_4, window_bounds = array<i64: 32, 1>}, {pipeline_mode = #tpu.pipeline_mode<synchronous>, transform_indices = @transform_5, window_bounds = array<i64: 32, 32>}, {pipeline_mode = #tpu.pipeline_mode<synchronous>, transform_indices = @transform_6, window_bounds = array<i64: 32, 1>}, {pipeline_mode = #tpu.pipeline_mode<synchronous>, transform_indices = @transform_7, window_bounds = array<i64: 1, 32>}, {transform_indices = @transform_8, window_bounds = array<i64: 2>}, {transform_indices = @transform_9, window_bounds = array<i64: 2>}, {transform_indices = @transform_10, window_bounds = array<i64: 1, 256>}]} {
    %c0 = arith.constant 0 : index
    %c0_0 = arith.constant 0 : index
    %0 = vector.load %arg1[%c0, %c0_0] : memref<8x256xf32, #tpu.memory_space<vmem>>, vector<8x256xf32>
    %c0_1 = arith.constant 0 : index
    %c0_2 = arith.constant 0 : index
    %1 = vector.load %arg2[%c0_1, %c0_2] : memref<32x8xf32, #tpu.memory_space<vmem>>, vector<32x8xf32>
    %cst = arith.constant dense<0.000000e+00> : vector<32x256xf32>
    %2 = tpu.matmul %1, %0, %cst {dimension_numbers = #tpu.dot_dimension_numbers<[1], [0], [0], [1], [0, 0, 1, 1], [], []>} : vector<32x8xf32>, vector<8x256xf32>, vector<32x256xf32> -> vector<32x256xf32>
    %c0_3 = arith.constant 0 : index
    %c0_4 = arith.constant 0 : index
    %3 = vector.load %arg3[%c0_3, %c0_4] : memref<32x1xf32, #tpu.memory_space<vmem>>, vector<32x1xf32>
    %4 = vector.broadcast %3 : vector<32x1xf32> to vector<32x256xf32>
    %5 = arith.addf %2, %4 : vector<32x256xf32>
    %cst_5 = arith.constant 0.000000e+00 : f32
    %6 = vector.broadcast %cst_5 : f32 to vector<32x256xf32>
    %7 = arith.maximumf %5, %6 : vector<32x256xf32>
    %8 = math.absf %5 : vector<32x256xf32>
    %cst_6 = arith.constant 0.000000e+00 : f32
    %9 = vector.broadcast %cst_6 : f32 to vector<32x256xf32>
    %10 = arith.subf %9, %8 : vector<32x256xf32>
    %11 = math.exp %10 : vector<32x256xf32>
    %12 = math.log1p %11 : vector<32x256xf32>
    %13 = arith.addf %7, %12 : vector<32x256xf32>
    %c0_7 = arith.constant 0 : index
    %c0_8 = arith.constant 0 : index
    %14 = vector.load %arg4[%c0_7, %c0_8] : memref<32x32xf32, #tpu.memory_space<vmem>>, vector<32x32xf32>
    %cst_9 = arith.constant dense<0.000000e+00> : vector<32x256xf32>
    %15 = tpu.matmul %14, %13, %cst_9 {dimension_numbers = #tpu.dot_dimension_numbers<[1], [0], [0], [1], [0, 0, 1, 1], [], []>} : vector<32x32xf32>, vector<32x256xf32>, vector<32x256xf32> -> vector<32x256xf32>
    %c0_10 = arith.constant 0 : index
    %c0_11 = arith.constant 0 : index
    %16 = vector.load %arg5[%c0_10, %c0_11] : memref<32x1xf32, #tpu.memory_space<vmem>>, vector<32x1xf32>
    %17 = vector.broadcast %16 : vector<32x1xf32> to vector<32x256xf32>
    %18 = arith.addf %15, %17 : vector<32x256xf32>
    %cst_12 = arith.constant 0.000000e+00 : f32
    %19 = vector.broadcast %cst_12 : f32 to vector<32x256xf32>
    %20 = arith.maximumf %18, %19 : vector<32x256xf32>
    %21 = math.absf %18 : vector<32x256xf32>
    %cst_13 = arith.constant 0.000000e+00 : f32
    %22 = vector.broadcast %cst_13 : f32 to vector<32x256xf32>
    %23 = arith.subf %22, %21 : vector<32x256xf32>
    %24 = math.exp %23 : vector<32x256xf32>
    %25 = math.log1p %24 : vector<32x256xf32>
    %26 = arith.addf %20, %25 : vector<32x256xf32>
    %c0_14 = arith.constant 0 : index
    %27 = memref.load %arg9[%c0_14] : memref<2xf32, #tpu.memory_space<smem>>
    %28 = vector.broadcast %27 : f32 to vector<32x256xf32>
    %29 = arith.mulf %28, %26 : vector<32x256xf32>
    %c0_15 = arith.constant 0 : index
    %30 = memref.load %arg10[%c0_15] : memref<2xf32, #tpu.memory_space<smem>>
    %31 = vector.broadcast %30 : f32 to vector<32x256xf32>
    %32 = arith.mulf %31, %13 : vector<32x256xf32>
    %33 = arith.addf %29, %32 : vector<32x256xf32>
    %c0_16 = arith.constant 0 : index
    %c0_17 = arith.constant 0 : index
    %34 = vector.load %arg6[%c0_16, %c0_17] : memref<32x32xf32, #tpu.memory_space<vmem>>, vector<32x32xf32>
    %cst_18 = arith.constant dense<0.000000e+00> : vector<32x256xf32>
    %35 = tpu.matmul %34, %33, %cst_18 {dimension_numbers = #tpu.dot_dimension_numbers<[1], [0], [0], [1], [0, 0, 1, 1], [], []>} : vector<32x32xf32>, vector<32x256xf32>, vector<32x256xf32> -> vector<32x256xf32>
    %c0_19 = arith.constant 0 : index
    %c0_20 = arith.constant 0 : index
    %36 = vector.load %arg7[%c0_19, %c0_20] : memref<32x1xf32, #tpu.memory_space<vmem>>, vector<32x1xf32>
    %37 = vector.broadcast %36 : vector<32x1xf32> to vector<32x256xf32>
    %38 = arith.addf %35, %37 : vector<32x256xf32>
    %cst_21 = arith.constant 0.000000e+00 : f32
    %39 = vector.broadcast %cst_21 : f32 to vector<32x256xf32>
    %40 = arith.maximumf %38, %39 : vector<32x256xf32>
    %41 = math.absf %38 : vector<32x256xf32>
    %cst_22 = arith.constant 0.000000e+00 : f32
    %42 = vector.broadcast %cst_22 : f32 to vector<32x256xf32>
    %43 = arith.subf %42, %41 : vector<32x256xf32>
    %44 = math.exp %43 : vector<32x256xf32>
    %45 = math.log1p %44 : vector<32x256xf32>
    %46 = arith.addf %40, %45 : vector<32x256xf32>
    %c1 = arith.constant 1 : index
    %47 = memref.load %arg9[%c1] : memref<2xf32, #tpu.memory_space<smem>>
    %48 = vector.broadcast %47 : f32 to vector<32x256xf32>
    %49 = arith.mulf %48, %46 : vector<32x256xf32>
    %c1_23 = arith.constant 1 : index
    %50 = memref.load %arg10[%c1_23] : memref<2xf32, #tpu.memory_space<smem>>
    %51 = vector.broadcast %50 : f32 to vector<32x256xf32>
    %52 = arith.mulf %51, %33 : vector<32x256xf32>
    %53 = arith.addf %49, %52 : vector<32x256xf32>
    %c0_24 = arith.constant 0 : index
    %c0_25 = arith.constant 0 : index
    %54 = vector.load %arg8[%c0_24, %c0_25] : memref<1x32xf32, #tpu.memory_space<vmem>>, vector<1x32xf32>
    %cst_26 = arith.constant dense<0.000000e+00> : vector<1x256xf32>
    %55 = tpu.matmul %54, %53, %cst_26 {dimension_numbers = #tpu.dot_dimension_numbers<[1], [0], [0], [1], [0, 0, 1, 1], [], []>} : vector<1x32xf32>, vector<32x256xf32>, vector<1x256xf32> -> vector<1x256xf32>
    %c0_27 = arith.constant 0 : index
    %c0_28 = arith.constant 0 : index
    %56 = vector.load %arg11[%c0_27, %c0_28] : memref<1x256xf32, #tpu.memory_space<vmem>>, vector<1x256xf32>
    tpu.vector_store %arg11[%c0_27, %c0_28], %55 {strides = array<i32>} : memref<1x256xf32, #tpu.memory_space<vmem>>, vector<1x256xf32>,
    return
  }
  func.func @transform_0(%arg0: i32) -> (i32, i32) {
    %c0_i32 = arith.constant 0 : i32
    %c0_i32_0 = arith.constant 0 : i32
    return %c0_i32, %arg0 : i32, i32
  }
  func.func @transform_1(%arg0: i32) -> (i32, i32) {
    %c0_i32 = arith.constant 0 : i32
    %c0_i32_0 = arith.constant 0 : i32
    %c0_i32_1 = arith.constant 0 : i32
    return %c0_i32, %c0_i32_0 : i32, i32
  }
  func.func @transform_2(%arg0: i32) -> (i32, i32) {
    %c0_i32 = arith.constant 0 : i32
    %c0_i32_0 = arith.constant 0 : i32
    %c0_i32_1 = arith.constant 0 : i32
    return %c0_i32, %c0_i32_0 : i32, i32
  }
  func.func @transform_3(%arg0: i32) -> (i32, i32) {
    %c0_i32 = arith.constant 0 : i32
    %c0_i32_0 = arith.constant 0 : i32
    %c0_i32_1 = arith.constant 0 : i32
    return %c0_i32, %c0_i32_0 : i32, i32
  }
  func.func @transform_4(%arg0: i32) -> (i32, i32) {
    %c0_i32 = arith.constant 0 : i32
    %c0_i32_0 = arith.constant 0 : i32
    %c0_i32_1 = arith.constant 0 : i32
    return %c0_i32, %c0_i32_0 : i32, i32
  }
  func.func @transform_5(%arg0: i32) -> (i32, i32) {
    %c0_i32 = arith.constant 0 : i32
    %c0_i32_0 = arith.constant 0 : i32
    %c0_i32_1 = arith.constant 0 : i32
    return %c0_i32, %c0_i32_0 : i32, i32
  }
  func.func @transform_6(%arg0: i32) -> (i32, i32) {
    %c0_i32 = arith.constant 0 : i32
    %c0_i32_0 = arith.constant 0 : i32
    %c0_i32_1 = arith.constant 0 : i32
    return %c0_i32, %c0_i32_0 : i32, i32
  }
  func.func @transform_7(%arg0: i32) -> (i32, i32) {
    %c0_i32 = arith.constant 0 : i32
    %c0_i32_0 = arith.constant 0 : i32
    %c0_i32_1 = arith.constant 0 : i32
    return %c0_i32, %c0_i32_0 : i32, i32
  }
  func.func @transform_8(%arg0: i32) -> i32 {
    %c0_i32 = arith.constant 0 : i32
    %c0_i32_0 = arith.constant 0 : i32
    return %c0_i32 : i32
  }
  func.func @transform_9(%arg0: i32) -> i32 {
    %c0_i32 = arith.constant 0 : i32
    %c0_i32_0 = arith.constant 0 : i32
    return %c0_i32 : i32
  }
  func.func @transform_10(%arg0: i32) -> (i32, i32) {
    %c0_i32 = arith.constant 0 : i32
    %c0_i32_0 = arith.constant 0 : i32
    return %c0_i32, %arg0 : i32, i32
  }
}

</mosaic_0001>

<bundles_post_ra>
// kernel: tpu_custom_call.1
= control target key start
LH: loop header
LB: loop body
LE: loop exit
PB: predicated region body
PF: predicated region fallthrough
CT: control target
= control target key end

     0   :  { %s2390_s0 = inlined_call_operand.vmem [shape: f32[8,768], index: 0, kind: input, shape index: {}]   ;;  %s2391_s1 = inlined_call_operand.vmem [shape: f32[32,8], index: 1, kind: input, shape index: {}]   ;;  %s2392_s2 = inlined_call_operand.vmem [shape: f32[32,1], index: 2, kind: input, shape index: {}]   ;;  %s2393_s3 = inlined_call_operand.vmem [shape: f32[32,32], index: 3, kind: input, shape index: {}]   ;;  %s2394_s4 = inlined_call_operand.vmem [shape: f32[32,1], index: 4, kind: input, shape index: {}]   ;;  %s2395_s5 = inlined_call_operand.vmem [shape: f32[32,32], index: 5, kind: input, shape index: {}]   ;;  %s2396_s6 = inlined_call_operand.vmem [shape: f32[32,1], index: 6, kind: input, shape index: {}]   ;;  %s2397_s7 = inlined_call_operand.vmem [shape: f32[1,32], index: 7, kind: input, shape index: {}]   ;;  %s2398_s8 = inlined_call_operand.vmem [shape: f32[2], index: 8, kind: input, shape index: {}]   ;;  %s2399_s9 = inlined_call_operand.vmem [shape: f32[2], index: 9, kind: input, shape index: {}]   ;;  %s2400_s10 = inlined_call_operand.hbm [shape: f32[1,768], index: 10, kind: output, shape index: {}]  }
   0x1   :  { %2404 = sst [smem:[#allocation11_spill]] %s2398_s8 }
   0x2   :  { %2405 = sst [smem:[#allocation12_spill]] %s2399_s9 }
   0x3   :  { %15 = vsyncpa [#allocation4], 0 }
   0x4   :  { %16 = vsyncpa [#allocation6], 0 }
   0x5   :  { %17 = vsyncpa [#allocation3], 0 }
   0x6   :  { %19 = vsyncpa [#allocation3 + $0x1], 0  ;;  %s1771_s13 = smov 0   ;;  %s1773_s14 = smov 0  }
   0x7   :  { %s1775_s15 = smov 0   ;;  %s1777_s16 = smov 0  }
   0x8 LB: > { %s1792_s17 = sadd.s32 4294967295, %s1708_s16   ;;  %s1389_s18 = sadd.s32 4294967294, %s1708_s16   ;;  %s1708_s16 = sphi %s1777_s16, %s2446_s16   ;;  %s1704_s15 = sphi %s1775_s15, %s2445_s15   ;;  %s1700_s14 = sphi %s1773_s14, %s2444_s14   ;;  %s1696_s13 = sphi %s1771_s13, %s2443_s13  }
   0x9   : > { %s1796_s19 = sadd.s32 1, %s1708_s16   ;;  %s247_s20 = sadd.s32 1, %s1704_s15 }
   0xa   : > { %s244_s21 = ssub.s32 %s1708_s16, %s1796_s19  ;;  %p257_p0 = scmp.ne.s32.totalorder %s1704_s15, %s1700_s14 }
   0xb   : > { %p245_p1 = scmp.eq.s32.totalorder %s244_s21, 0  ;;  %p258_p2 = scmp.eq.s32.totalorder %s1792_s17, 2 }
   0xc   : > { %p263_p3 = scmp.ne.s32.totalorder %s1700_s14, %s1696_s13  ;;  %p264_p4 = scmp.eq.s32.totalorder %s1389_s18, 2 }
   0xd   : > { %s1807_s22 = scalar_select %p245_p1, %s1704_s15, %s247_s20  }
   0xe   : > { %p1809_p5 = por %p258_p2, %p257_p0  ;;  %p1813_p6 = por %p264_p4, %p263_p3 }
   0xf   : > { %p1390_p7 = scmp.ge.s32.totalorder %s1708_s16, 1  ;;  %p271_p8 = scmp.lt.s32.totalorder %s1708_s16, 4 }
  0x10   : > { %s2406_s23 = scalar_select %p1809_p5, 1, 0 }
  0x11   : > { %s2407_s24 = scalar_select %p1813_p6, 1, 0 }
  0x12   : > { %p2401_p9 = scmp.eq.s32.totalorder %s1792_s17, 0  ;;  %p1820_p10 = pnand %p1390_p7, %p271_p8 }
  0x13   : > { %s2409_s8 = sld [smem:[#allocation11_spill]]  ;;  %s2410_s9 = sld [smem:[#allocation12_spill]] }
  0x14   : > { %s2408_s25 = scalar_select %p1820_p10, 1, 0 }
  0x15   : > { %p1457_p11 = pneg %p1820_p10 }
  0x17   : > { %p1834_p12 = pnand %p2401_p9, %p1457_p11 }
  0x19   : > { %s305_s28 = sshll.u32 %s2409_s8, 4  ;;  %s316_s11 = sshll.u32 %s2410_s9, 4  ;;  %s306_s28 = int_to_ptr.vmem [resolvable:$true] %s305_s28  ;;  %s317_s11 = int_to_ptr.vmem [resolvable:$true] %s316_s11 }
  0x1a   : > { %s1608_s18 = scalar_lea.vmem %s306_s28, 16  ;;  %p1610_p0 = pneg %p1834_p12 }
  0x1b   : > { %p1609_p13 = scmp.ne.s32.totalorder %s306_s28, %s1608_s18  ;;  %p1616_p3 = scmp.lt.s32.totalorder %s306_s28, %s306_s28 }
  0x1c   : > { %p1617_p4 = scmp.lt.s32.totalorder %s1608_s18, %s1608_s18 }
  0x1d   : > { %p1611_p1 = pnand %p1610_p0, %p1609_p13 }
  0x1e   : > { %p1618_p7 = por %p1617_p4, %p1616_p3 }
  0x1f   : > { %p1612_p2 = pneg %p1611_p1 }
  0x21   : > { %p1619_p8 = pnand %p1618_p7, %p1612_p2 }
  0x23   : > { %1622 = shalt.err (!%p1619_p8)
}
  0x24   : > { %s1710_s20 = smov [#allocation2]   ;;  %s1623_s21 = scalar_lea.vmem %s317_s11, 16 }
  0x25   : > { %1460 = dma.vmem_to_smem (!%p1834_p12), %s306_s28, 16, %s1710_s20, [#allocation4]  }
  0x26   : > { %p1624_p11 = scmp.ne.s32.totalorder %s317_s11, %s1623_s21  ;;  %p1631_p5 = scmp.lt.s32.totalorder %s317_s11, %s317_s11 }
  0x27   : > { %p1632_p10 = scmp.lt.s32.totalorder %s1623_s21, %s1623_s21 }
  0x28   : > { %p1626_p9 = pnand %p1624_p11, %p1610_p0 }
  0x29   : > { %p1633_p13 = por %p1632_p10, %p1631_p5 }
  0x2a   : > { %p1627_p6 = pneg %p1626_p9 }
  0x2c   : > { %p1634_p1 = pnand %p1633_p13, %p1627_p6 }
  0x2e   : > { %1637 = shalt.err (!%p1634_p1)
}
  0x2f   : > { %s1711_s26 = smov [#allocation5]   ;;  %p2412_p2 = scmp.ne.s32.totalorder %s2408_s25, 0 }
  0x30   : > { %1463 = dma.vmem_to_smem (!%p1834_p12), %s317_s11, 16, %s1711_s26, [#allocation6]  }
  0x31   : > { %338 = sbr.rel (%p2412_p2) target bundleno = 1135 (0x46f), region = 60  ;;  %p2413_p3 = scmp.eq.s32.totalorder (!%p2412_p2), %s1792_s17, 0 }
  0x38   : > { %1683 = dma.done.wait (%p2413_p3), [#allocation4], 16   ;;  %p2414_p4 = pmov %p2413_p3 }
  0x39   : > { %p2415_p9 = pmov %p2413_p3 }
  0x3a   : > { %1685 = vsyncadd (%p2414_p4), [#allocation4], 4294967280 }
  0x3b   : > { %1687 = dma.done.wait (%p2415_p9), [#allocation6], 16   ;;  %p2416_p5 = pmov %p2413_p3 }
  0x3d   : > { %1689 = vsyncadd (%p2416_p5), [#allocation6], 4294967280 }
  0x3e   : > { %348 = sfence }
  0x3f   : > { %s1398_s27 = sshll.u32 %s1792_s17, 1  ;;  %v1712_v0 = vmov 0.0   ;;  %v394_v1 = vld [vmem:[%s2392_s2] sm:$0xff]  ;;  %v396_v2 = vld [vmem:[%s2392_s2 + $0x10] sm:$0xff]  ;;  %v1713_v3 = vmov 0   ;;  %v395_v4 = vld [vmem:[%s2392_s2 + $0x8] sm:$0xff] }
  0x40   : > { %p382_p6 = scmp.lt.s32.totalorder %s1398_s27, 5  ;;  %495 = vmatprep.mubr.f32.mxu0 %v1712_v0  ;;  %507 = vmatprep.mubr.f32.mxu1 %v1712_v0  ;;  %v397_v5 = vld [vmem:[%s2392_s2 + $0x18] sm:$0xff]  ;;  %v390_v6 = vld [vmem:[%s2391_s1] sm:$0xff]  ;;  %vm418_vm0 = vcmask 64512   ;;  %v392_v9 = vld [vmem:[%s2391_s1 + $0x10] sm:$0xff]  ;;  %vm668_vm9 = vcmask 261120  }
  0x41   : > { %1510 = vset.pattern.permute.xlu0 %v1713_v3  ;;  %1511 = vset.pattern.permute.xlu1 %v1713_v3  ;;  %v644_v10 = vld [vmem:[%s2394_s4] sm:$0xff]  ;;  %v645_v11 = vld [vmem:[%s2394_s4 + $0x8] sm:$0xff]  ;;  %v393_v13 = vld [vmem:[%s2391_s1 + $0x18] sm:$0xff]  ;;  %s900_s12 = sld [smem:[#allocation5]]  ;;  %s1413_s30 = sld [smem:[#allocation5 + $0x1]] }
  0x42   : > { %s2448_s27 = smov (!%p382_p6, %s1398_s27), 5  ;;  %400 = vperm.xlu0 %1510, %v394_v1   ;;  %410 = vperm.xlu1 %1511, %v396_v2   ;;  %v391_v12 = vld [vmem:[%s2391_s1 + $0x8] sm:$0xff]  ;;  %v646_v14 = vld [vmem:[%s2394_s4 + $0x10] sm:$0xff]  ;;  %v647_v15 = vld [vmem:[%s2394_s4 + $0x18] sm:$0xff]  ;;  %s890_s18 = sld [smem:[#allocation2]] }
  0x43   : > { %s1399_s21 = sshll.u32 %s2448_s27, 3  ;;  %v922_v16 = vld [vmem:[%s2396_s6] sm:$0xff]  ;;  %v923_v17 = vld [vmem:[%s2396_s6 + $0x8] sm:$0xff]  ;;  %v924_v18 = vld [vmem:[%s2396_s6 + $0x10] sm:$0xff]  ;;  %s1412_s27 = sld [smem:[#allocation2 + $0x1]] }
  0x44   : > { %s385_s28 = scalar_lea.vmem %s2390_s0, %s1399_s21  ;;  %v925_v19 = vld [vmem:[%s2396_s6 + $0x18] sm:$0xff]  ;;  %s1420_s9 = sshll.u32 %s1792_s17, 5 }
  0x45   : > { %v389_v7 = vld [vmem:[%s385_s28 + $0x8] sm:$0xff]  ;;  %v388_v8 = vld [vmem:[%s385_s28] sm:$0xff]  ;;  %s2348_s28 = scalar_lea.hbm %s2400_s10, %s1420_s9  ;;  %p2441_p12 = scmp.ne.s32.totalorder %s2406_s23, 0 }
  0x46   : > { %405 = vperm.xlu0 %1510, %v395_v4   ;;  %415 = vperm.xlu1 %1511, %v397_v5   ;;  %s1715_s17 = smov [#allocation7]  }
  0x47   : > { %431 = vmatprep.subr.mxu0 %v389_v7  ;;  %1445 = vmatprep.subr.mxu1 %v389_v7 }
  0x48   : > { %432 = vmatpush1.msra.mxu0 %v388_v8  ;;  %1446 = vmatpush1.msra.mxu1 %v388_v8 }
  0x49   : > { %1400 = vmatmul.mubr.msk.f32.vlgmr.msra.gmra.mrb[0].mxu0 %vm418_vm0, %v390_v6  ;;  %1402 = vmatmul.mubr.msk.f32.vlgmr.msra.gmra.mrb[0].mxu1 %vm418_vm0, %v392_v9 }
  0x4a   : > { %501 = vmatprep.mubr.f32.mxu0 %v1712_v0  ;;  %513 = vmatprep.mubr.f32.mxu1 %v1712_v0 }
  0x4b   : > { %650 = vperm.xlu0 %1510, %v644_v10   ;;  %655 = vperm.xlu1 %1511, %v645_v11  }
  0x4d   : > { %1401 = vmatmul.mubr.msk.f32.gmra.mrb[2].mxu0 %vm418_vm0, %v391_v12  ;;  %1403 = vmatmul.mubr.msk.f32.gmra.mrb[2].mxu1 %vm418_vm0, %v393_v13 }
  0x4e   : > { %745 = vmatprep.mubr.f32.mxu1 %v1712_v0  ;;  %1022 = vmatprep.mubr.f32.mxu0 %v1712_v0 }
  0x4f   : > { %660 = vperm.xlu0 %1510, %v646_v14   ;;  %665 = vperm.xlu1 %1511, %v647_v15  }
  0x53   : > { %928 = vperm.xlu0 %1510, %v922_v16   ;;  %933 = vperm.xlu1 %1511, %v923_v17  }
  0x57   : > { %938 = vperm.xlu0 %1510, %v924_v18   ;;  %943 = vperm.xlu1 %1511, %v925_v19  }
  0xc1   : > { %v401_v20 = vpop.permute.xlu0 %400  ;;  %v411_v21 = vpop.permute.xlu1 %410 }
  0xc5   : > { %v406_v32 = vpop.permute.xlu0 %405  ;;  %v416_v33 = vpop.permute.xlu1 %415 }
 0x11c   : > { %v497_v22 = vpop.f32.mrb[0].mxu0  ;;  %v509_v23 = vpop.f32.mrb[0].mxu1 }
 0x11d   : > { %v1916_v24 = vadd.f32 %v497_v22, %v401_v20  ;;  %v1918_v25 = vadd.f32 %v509_v23, %v411_v21  ;;  %v499_v26 = vpop.f32.mrb[1].mxu0  ;;  %v511_v27 = vpop.f32.mrb[1].mxu1 }
 0x11e   : > { %v1920_v28 = vadd.f32 %v499_v26, %v401_v20  ;;  %v1922_v29 = vadd.f32 %v511_v27, %v411_v21 }
 0x11f   : > { %v528_v30 = vand.u32 2147483647, %v1916_v24  ;;  %v532_v31 = vand.u32 2147483647, %v1918_v25  ;;  %v520_v13 = vmax.f32 %v1916_v24, 0.0  ;;  %v524_v19 = vmax.f32 %v1918_v25, 0.0 }
 0x120   : > { %v529_v34 = vand.u32 2147483647, %v1920_v28  ;;  %v533_v35 = vand.u32 2147483647, %v1922_v29  ;;  %v503_v38 = vpop.f32.mrb[2].mxu0  ;;  %v515_v39 = vpop.f32.mrb[2].mxu1 }
 0x121   : > { %v536_v36 = vsub.f32 0.0, %v528_v30  ;;  %v540_v37 = vsub.f32 0.0, %v532_v31  ;;  %v1928_v42 = vadd.f32 %v503_v38, %v406_v32  ;;  %v1930_v43 = vadd.f32 %v515_v39, %v416_v33  ;;  %v505_v44 = vpop.f32.mrb[3].mxu0  ;;  %v517_v45 = vpop.f32.mrb[3].mxu1 }
 0x122   : > { %v537_v40 = vsub.f32 0.0, %v529_v34  ;;  %v541_v41 = vsub.f32 0.0, %v533_v35  ;;  %v1932_v48 = vadd.f32 %v505_v44, %v406_v32  ;;  %v1934_v49 = vadd.f32 %v517_v45, %v416_v33 }
 0x123   : > { %v544_v46 = vmul.f32 1.442695, %v536_v36  ;;  %v552_v47 = vmul.f32 1.442695, %v540_v37  ;;  %v530_v52 = vand.u32 2147483647, %v1928_v42 }
 0x124   : > { %v546_v50 = vmul.f32 1.442695, %v537_v40  ;;  %v554_v51 = vmul.f32 1.442695, %v541_v41  ;;  %v534_v53 = vand.u32 2147483647, %v1930_v43 }
 0x125   : > { %1512 = vpow2.f32 %v544_v46  ;;  %v531_v54 = vand.u32 2147483647, %v1932_v48  ;;  %v535_v55 = vand.u32 2147483647, %v1934_v49  ;;  %v538_v56 = vsub.f32 0.0, %v530_v52 }
 0x126   : > { %1514 = vpow2.f32 %v552_v47  ;;  %v542_v57 = vsub.f32 0.0, %v534_v53  ;;  %v521_v20 = vmax.f32 %v1920_v28, 0.0  ;;  %v522_v23 = vmax.f32 %v1928_v42, 0.0 }
 0x127   : > { %1516 = vpow2.f32 %v546_v50  ;;  %v539_v58 = vsub.f32 0.0, %v531_v54  ;;  %v543_v59 = vsub.f32 0.0, %v535_v55  ;;  %v548_v60 = vmul.f32 1.442695, %v538_v56 }
 0x128   : > { %1518 = vpow2.f32 %v554_v51  ;;  %v556_v61 = vmul.f32 1.442695, %v542_v57  ;;  %v526_v27 = vmax.f32 %v1930_v43, 0.0  ;;  %v523_v46 = vmax.f32 %v1932_v48, 0.0 }
 0x129   : > { %v550_v62 = vmul.f32 1.442695, %v539_v58  ;;  %v558_v63 = vmul.f32 1.442695, %v543_v59  ;;  %1520 = vpow2.f32 %v548_v60  ;;  %v527_v43 = vmax.f32 %v1934_v49, 0.0  ;;  %v641_v49 = vld [vmem:[%s2393_s3 + $0x8] sm:$0xff] }
 0x12a   : > { %1522 = vpow2.f32 %v556_v61 }
 0x12b   : > { %1524 = vpow2.f32 %v550_v62 }
 0x12c   : > { %1526 = vpow2.f32 %v558_v63 }
 0x12f   : > { %v1513_v1 = vpop.eup %1512 }
 0x130   : > { %v1515_v2 = vpop.eup %1514  ;;  %v560_v3 = vadd.f32 1.0, %v1513_v1  ;;  %v563_v14 = vmul.f32 -0.5, %v1513_v1  ;;  %v566_v16 = vand.u32 2147483647, %v1513_v1 }
 0x131   : > { %v1517_v4 = vpop.eup %1516  ;;  %v596_v5 = vadd.f32 1.0, %v1515_v2  ;;  %v599_v17 = vmul.f32 -0.5, %v1515_v2  ;;  %v602_v31 = vand.u32 2147483647, %v1515_v2 }
 0x132   : > { %v1940_v6 = vpop.eup %1518  ;;  %1528 = vlog2.f32 %v560_v3  ;;  %v569_v7 = vadd.f32 1.0, %v1517_v4  ;;  %v572_v21 = vmul.f32 -0.5, %v1517_v4  ;;  %v564_v30 = vadd.f32 1.0, %v563_v14 }
 0x133   : > { %1530 = vlog2.f32 %v596_v5  ;;  %v605_v8 = vadd.f32 1.0, %v1940_v6  ;;  %v1521_v9 = vpop.eup %1520  ;;  %vm1954_vm1 = vcmp.lt.f32.partialorder %v566_v16, 0.0004427343  ;;  %v600_v35 = vadd.f32 1.0, %v599_v17 }
 0x134   : > { %1532 = vlog2.f32 %v569_v7  ;;  %v1523_v10 = vpop.eup %1522  ;;  %v578_v11 = vadd.f32 1.0, %v1521_v9  ;;  %v581_v26 = vmul.f32 -0.5, %v1521_v9  ;;  %v573_v38 = vadd.f32 1.0, %v572_v21 }
 0x135   : > { %v1943_v12 = vpop.eup %1524  ;;  %1534 = vlog2.f32 %v605_v8  ;;  %v614_v18 = vadd.f32 1.0, %v1523_v10  ;;  %v617_v36 = vmul.f32 -0.5, %v1523_v10  ;;  %v575_v39 = vand.u32 2147483647, %v1517_v4 }
 0x136   : > { %v1946_v15 = vpop.eup %1526  ;;  %1536 = vlog2.f32 %v578_v11  ;;  %v587_v22 = vadd.f32 1.0, %v1943_v12  ;;  %v590_v37 = vmul.f32 -0.5, %v1943_v12  ;;  %v608_v40 = vmul.f32 -0.5, %v1940_v6 }
 0x137   : > { %1538 = vlog2.f32 %v614_v18  ;;  %v623_v32 = vadd.f32 1.0, %v1946_v15  ;;  %v611_v42 = vand.u32 2147483647, %v1940_v6  ;;  %v582_v44 = vadd.f32 1.0, %v581_v26 }
 0x138   : > { %1540 = vlog2.f32 %v587_v22  ;;  %v584_v45 = vand.u32 2147483647, %v1521_v9  ;;  %v565_v51 = vmul.f32 %v1513_v1, %v564_v30  ;;  %vm1962_vm2 = vcmp.lt.f32.partialorder %v602_v31, 0.0004427343 }
 0x139   : > { %1542 = vlog2.f32 %v623_v32  ;;  %v626_v53 = vmul.f32 -0.5, %v1946_v15  ;;  %v601_v54 = vmul.f32 %v1515_v2, %v600_v35  ;;  %v618_v55 = vadd.f32 1.0, %v617_v36 }
 0x13a   : > { %v620_v56 = vand.u32 2147483647, %v1523_v10  ;;  %v591_v57 = vadd.f32 1.0, %v590_v37  ;;  %v574_v60 = vmul.f32 %v1517_v4, %v573_v38  ;;  %vm1967_vm3 = vcmp.lt.f32.partialorder %v575_v39, 0.0004427343 }
 0x13b   : > { %v609_v48 = vadd.f32 1.0, %v608_v40  ;;  %vm1971_vm4 = vcmp.lt.f32.partialorder %v611_v42, 0.0004427343  ;;  %v583_v3 = vmul.f32 %v1521_v9, %v582_v44  ;;  %vm1975_vm5 = vcmp.lt.f32.partialorder %v584_v45, 0.0004427343  ;;  %v642_v42 = vld [vmem:[%s2393_s3 + $0x10] sm:$0xff]  ;;  %v651_v45 = vpop.permute.xlu0 %650 }
 0x13c   : > { %v1529_v33 = vpop.eup %1528  ;;  %v593_v7 = vand.u32 2147483647, %v1943_v12  ;;  %v627_v8 = vadd.f32 1.0, %v626_v53  ;;  %v619_v14 = vmul.f32 %v1523_v10, %v618_v55  ;;  %vm1982_vm6 = vcmp.lt.f32.partialorder %v620_v56, 0.0004427343  ;;  %v643_v44 = vld [vmem:[%s2393_s3 + $0x18] sm:$0xff]  ;;  %v656_v53 = vpop.permute.xlu1 %655 }
 0x13d   : > { %v1531_v41 = vpop.eup %1530  ;;  %v562_v50 = vmul.f32 0.6931472, %v1529_v33  ;;  %v592_v17 = vmul.f32 %v1943_v12, %v591_v57  ;;  %v629_v9 = vand.u32 2147483647, %v1946_v15  ;;  %v610_v34 = vmul.f32 %v1940_v6, %v609_v48 }
 0x13e   : > { %v1533_v47 = vpop.eup %1532  ;;  %v598_v59 = vmul.f32 0.6931472, %v1531_v41  ;;  %vm594_vm7 = vcmp.lt.f32.partialorder %v593_v7, 0.0004427343  ;;  %v628_v36 = vmul.f32 %v1946_v15, %v627_v8 }
 0x13f   : > { %v1535_v58 = vpop.eup %1534  ;;  %v571_v63 = vmul.f32 0.6931472, %v1533_v47  ;;  %v568_v5 = vsel %vm1954_vm1, %v565_v51, %v562_v50  ;;  %vm630_vm8 = vcmp.lt.f32.partialorder %v629_v9, 0.0004427343 }
 0x140   : > { %v1537_v62 = vpop.eup %1536  ;;  %v604_v21 = vsel %vm1962_vm2, %v601_v54, %v598_v59  ;;  %v607_v22 = vmul.f32 0.6931472, %v1535_v58  ;;  %v1994_v10 = vadd.f32 %v568_v5, %v520_v13  ;;  %v666_v16 = vpop.permute.xlu1 %665 }
 0x141   : > { %v580_v4 = vmul.f32 0.6931472, %v1537_v62  ;;  %v1539_v11 = vpop.eup %1538  ;;  %v577_v31 = vsel %vm1967_vm3, %v574_v60, %v571_v63  ;;  %v2006_v24 = vadd.f32 %v604_v21, %v524_v19  ;;  %v525_v19 = vmax.f32 %v1922_v29, 0.0  ;;  %v640_v29 = vld [vmem:[%s2393_s3] sm:$0xff]  ;;  %v661_v62 = vpop.permute.xlu0 %660 }
 0x142   : > { %v1541_v18 = vpop.eup %1540  ;;  %v616_v30 = vmul.f32 0.6931472, %v1539_v11  ;;  %v2016_v6 = vadd.f32 %v577_v31, %v521_v20  ;;  %v613_v38 = vsel %vm1971_vm4, %v610_v34, %v607_v22 }
 0x143   : > { %v586_v26 = vsel %vm1975_vm5, %v583_v3, %v580_v4  ;;  %v589_v12 = vmul.f32 0.6931472, %v1541_v18  ;;  %v1543_v33 = vpop.eup %1542  ;;  %v2028_v20 = vadd.f32 %v613_v38, %v525_v19 }
 0x144   : > { %v1998_v32 = vadd.f32 %v586_v26, %v522_v23  ;;  %v622_v35 = vsel %vm1982_vm6, %v619_v14, %v616_v30  ;;  %v625_v25 = vmul.f32 0.6931472, %v1543_v33 }
 0x145   : > { %v2012_v23 = vadd.f32 %v622_v35, %v526_v27  ;;  %v595_v37 = vsel %vm594_vm7, %v592_v17, %v589_v12 }
 0x146   : > { %v1423_v13 = vpack.c.bf16 %v1998_v32, %v1994_v10  ;;  %v2020_v15 = vadd.f32 %v595_v37, %v523_v46  ;;  %v631_v27 = vsel %vm630_vm8, %v628_v36, %v625_v25  ;;  %v2077_v25 = vstv %s900_s12 }
 0x147   : > { %v1427_v39 = vpack.c.bf16 %v2012_v23, %v2006_v24  ;;  %v2030_v40 = vadd.f32 %v631_v27, %v527_v43 }
 0x148   : > { %v1421_v28 = vpack.c.bf16 %v2020_v15, %v2016_v6 }
 0x149   : > { %v1425_v41 = vpack.c.bf16 %v2030_v40, %v2028_v20 }
 0x14a   : > { %1422 = vmatprep.subr.bf16.mxu1 %v1421_v28  ;;  %v2084_v28 = vmul.f32 %v2077_v25, %v1994_v10  ;;  %v2101_v10 = vmul.f32 %v2077_v25, %v2020_v15 }
 0x14b   : > { %1424 = vmatpush1.bf16.msra.mxu1 %v1423_v13 }
 0x14c   : > { %1426 = vmatprep.subr.bf16.mxu1 %v1425_v41  ;;  %v2088_v41 = vmul.f32 %v2077_v25, %v2006_v24  ;;  %v2103_v24 = vstv %s890_s18  ;;  %s378_s18 = sand.u32 1, %s1700_s14  }
 0x14d   : > { %s1397_s8 = sshll.u32 %s378_s18, 1  ;;  %s1294_s29 = scalar_lea.sflag [#allocation3], %s378_s18 }
 0x14e   : > { %s380_s20 = scalar_lea.vmem [#allocation7], %s1397_s8 }
 0x14f   : > { %1428 = vmatpush1.bf16.msra.mxu1 %v1427_v39  ;;  %s1308_s21 = sshll.u32 %s380_s20, 4  ;;  %s2350_s21 = int_to_ptr.vmem [resolvable:$true] %s1308_s21 }
 0x152   : > { %1404 = vmatmul.mubr.msk.f32.vlgmr.msra.gmra.mrb[4].mxu1 %vm668_vm9, %v640_v29  ;;  %v2092_v29 = vmul.f32 %v2077_v25, %v2016_v6 }
 0x153   : > { %751 = vmatprep.mubr.f32.mxu1 %v1712_v0 }
 0x156   : > { %1405 = vmatmul.mubr.msk.f32.gmra.mrb[6].mxu1 %vm668_vm9, %v641_v49 }
 0x157   : > { %757 = vmatprep.mubr.f32.mxu1 %v1712_v0 }
 0x15a   : > { %1406 = vmatmul.mubr.msk.f32.gmra.mrb[8].mxu1 %vm668_vm9, %v642_v42 }
 0x15b   : > { %763 = vmatprep.mubr.f32.mxu1 %v1712_v0 }
 0x15e   : > { %1407 = vmatmul.mubr.msk.f32.gmra.mrb[10].mxu1 %vm668_vm9, %v643_v44 }
 0x15f   : > { %1263 = vmatprep.mubr.f32.mxu1 %v1712_v0 }
 0x225   : > { %v747_v46 = vpop.f32.mrb[4].mxu1 }
 0x226   : > { %v2054_v47 = vadd.f32 %v747_v46, %v651_v45  ;;  %v749_v50 = vpop.f32.mrb[5].mxu1 }
 0x227   : > { %v2056_v51 = vadd.f32 %v749_v50, %v651_v45  ;;  %v2097_v50 = vmul.f32 %v2077_v25, %v1998_v32 }
 0x228   : > { %v778_v52 = vand.u32 2147483647, %v2054_v47  ;;  %v770_v6 = vmax.f32 %v2054_v47, 0.0 }
 0x229   : > { %v779_v54 = vand.u32 2147483647, %v2056_v51  ;;  %v753_v55 = vpop.f32.mrb[6].mxu1 }
 0x22a   : > { %v786_v56 = vsub.f32 0.0, %v778_v52  ;;  %v2060_v57 = vadd.f32 %v753_v55, %v656_v53  ;;  %v755_v58 = vpop.f32.mrb[7].mxu1 }
 0x22b   : > { %v787_v59 = vsub.f32 0.0, %v779_v54  ;;  %v2062_v60 = vadd.f32 %v755_v58, %v656_v53  ;;  %v771_v53 = vmax.f32 %v2056_v51, 0.0 }
 0x22c   : > { %v794_v61 = vmul.f32 1.442695, %v786_v56  ;;  %v780_v48 = vand.u32 2147483647, %v2060_v57  ;;  %v772_v54 = vmax.f32 %v2060_v57, 0.0 }
 0x22d   : > { %v796_v63 = vmul.f32 1.442695, %v787_v59  ;;  %v781_v1 = vand.u32 2147483647, %v2062_v60  ;;  %v759_v3 = vpop.f32.mrb[8].mxu1  ;;  %v773_v58 = vmax.f32 %v2062_v60, 0.0 }
 0x22e   : > { %1544 = vpow2.f32 %v794_v61  ;;  %v788_v2 = vsub.f32 0.0, %v780_v48  ;;  %v2066_v5 = vadd.f32 %v759_v3, %v661_v62  ;;  %v761_v4 = vpop.f32.mrb[9].mxu1 }
 0x22f   : > { %1546 = vpow2.f32 %v796_v63  ;;  %v789_v7 = vsub.f32 0.0, %v781_v1  ;;  %v2068_v8 = vadd.f32 %v761_v4, %v661_v62 }
 0x230   : > { %v798_v11 = vmul.f32 1.442695, %v788_v2  ;;  %v782_v14 = vand.u32 2147483647, %v2066_v5  ;;  %v774_v51 = vmax.f32 %v2066_v5, 0.0  ;;  %v907_v5 = vmul.f32 %v2077_v25, %v2028_v20 }
 0x231   : > { %v800_v17 = vmul.f32 1.442695, %v789_v7  ;;  %v783_v9 = vand.u32 2147483647, %v2068_v8  ;;  %v765_v18 = vpop.f32.mrb[10].mxu1  ;;  %v775_v57 = vmax.f32 %v2068_v8, 0.0 }
 0x232   : > { %1548 = vpow2.f32 %v798_v11  ;;  %v790_v21 = vsub.f32 0.0, %v782_v14  ;;  %v2072_v22 = vadd.f32 %v765_v18, %v666_v16  ;;  %v767_v26 = vpop.f32.mrb[11].mxu1 }
 0x233   : > { %1550 = vpow2.f32 %v800_v17  ;;  %v791_v30 = vsub.f32 0.0, %v783_v9  ;;  %v2075_v35 = vadd.f32 %v767_v26, %v666_v16 }
 0x234   : > { %v802_v31 = vmul.f32 1.442695, %v790_v21  ;;  %v784_v12 = vand.u32 2147483647, %v2072_v22 }
 0x235   : > { %v804_v33 = vmul.f32 1.442695, %v791_v30  ;;  %v785_v39 = vand.u32 2147483647, %v2075_v35 }
 0x236   : > { %1552 = vpow2.f32 %v802_v31  ;;  %v792_v34 = vsub.f32 0.0, %v784_v12 }
 0x237   : > { %1554 = vpow2.f32 %v804_v33  ;;  %v793_v46 = vsub.f32 0.0, %v785_v39 }
 0x238   : > { %v1545_v36 = vpop.eup %1544  ;;  %v806_v13 = vmul.f32 1.442695, %v792_v34 }
 0x239   : > { %v1547_v37 = vpop.eup %1546  ;;  %v810_v38 = vadd.f32 1.0, %v1545_v36  ;;  %v813_v42 = vmul.f32 -0.5, %v1545_v36  ;;  %v816_v32 = vand.u32 2147483647, %v1545_v36  ;;  %v808_v62 = vmul.f32 1.442695, %v793_v46 }
 0x23a   : > { %v819_v19 = vadd.f32 1.0, %v1547_v37  ;;  %1556 = vpow2.f32 %v806_v13  ;;  %v822_v44 = vmul.f32 -0.5, %v1547_v37  ;;  %v825_v1 = vand.u32 2147483647, %v1547_v37 }
 0x23b   : > { %1558 = vlog2.f32 %v810_v38  ;;  %v814_v59 = vadd.f32 1.0, %v813_v42  ;;  %vm2121_vm10 = vcmp.lt.f32.partialorder %v816_v32, 0.0004427343 }
 0x23c   : > { %v1549_v43 = vpop.eup %1548  ;;  %1560 = vlog2.f32 %v819_v19  ;;  %v823_v61 = vadd.f32 1.0, %v822_v44  ;;  %vm826_vm11 = vcmp.lt.f32.partialorder %v825_v1, 0.0004427343 }
 0x23d   : > { %v2080_v27 = vpop.eup %1550  ;;  %v828_v49 = vadd.f32 1.0, %v1549_v43  ;;  %v831_v56 = vmul.f32 -0.5, %v1549_v43  ;;  %v834_v3 = vand.u32 2147483647, %v1549_v43  ;;  %v815_v9 = vmul.f32 %v1545_v36, %v814_v59 }
 0x23e   : > { %v837_v45 = vadd.f32 1.0, %v2080_v27  ;;  %v840_v47 = vmul.f32 -0.5, %v2080_v27  ;;  %v843_v11 = vand.u32 2147483647, %v2080_v27  ;;  %v824_v18 = vmul.f32 %v1547_v37, %v823_v61 }
 0x23f   : > { %1562 = vlog2.f32 %v828_v49  ;;  %v832_v7 = vadd.f32 1.0, %v831_v56  ;;  %vm2130_vm12 = vcmp.lt.f32.partialorder %v834_v3, 0.0004427343 }
 0x240   : > { %v2105_v52 = vpop.eup %1552  ;;  %1564 = vlog2.f32 %v837_v45  ;;  %v841_v26 = vadd.f32 1.0, %v840_v47  ;;  %vm2134_vm13 = vcmp.lt.f32.partialorder %v843_v11, 0.0004427343 }
 0x241   : > { %v2110_v55 = vpop.eup %1554  ;;  %v846_v15 = vadd.f32 1.0, %v2105_v52  ;;  %v849_v60 = vmul.f32 -0.5, %v2105_v52  ;;  %v833_v36 = vmul.f32 %v1549_v43, %v832_v7  ;;  %v852_v42 = vand.u32 2147483647, %v2105_v52 }
 0x242   : > { %v855_v48 = vadd.f32 1.0, %v2110_v55  ;;  %v858_v30 = vmul.f32 -0.5, %v2110_v55  ;;  %v842_v32 = vmul.f32 %v2080_v27, %v841_v26 }
 0x243   : > { %1566 = vlog2.f32 %v846_v15  ;;  %v850_v33 = vadd.f32 1.0, %v849_v60  ;;  %vm853_vm14 = vcmp.lt.f32.partialorder %v852_v42, 0.0004427343 }
 0x244   : > { %v2118_v63 = vpop.eup %1556  ;;  %1568 = vlog2.f32 %v855_v48  ;;  %v859_v56 = vadd.f32 1.0, %v858_v30 }
 0x245   : > { %v1559_v2 = vpop.eup %1558  ;;  %v864_v14 = vadd.f32 1.0, %v2118_v63  ;;  %1570 = vpow2.f32 %v808_v62  ;;  %v867_v44 = vmul.f32 -0.5, %v2118_v63  ;;  %v851_v15 = vmul.f32 %v2105_v52, %v850_v33 }
 0x246   : > { %v1561_v16 = vpop.eup %1560  ;;  %v812_v17 = vmul.f32 0.6931472, %v1559_v2  ;;  %v870_v27 = vand.u32 2147483647, %v2118_v63 }
 0x247   : > { %v821_v21 = vmul.f32 0.6931472, %v1561_v16  ;;  %1572 = vlog2.f32 %v864_v14  ;;  %v868_v60 = vadd.f32 1.0, %v867_v44  ;;  %v776_v14 = vmax.f32 %v2072_v22, 0.0 }
 0x248   : > { %v818_v31 = vsel %vm2121_vm10, %v815_v9, %v812_v17  ;;  %vm871_vm0 = vcmp.lt.f32.partialorder %v870_v27, 0.0004427343 }
 0x249   : > { %v1563_v34 = vpop.eup %1562  ;;  %v882_v13 = vadd.f32 %v818_v31, %v770_v6  ;;  %v827_v38 = vsel %vm826_vm11, %v824_v18, %v821_v21  ;;  %v869_v21 = vmul.f32 %v2118_v63, %v868_v60 }
 0x24a   : > { %v1565_v19 = vpop.eup %1564  ;;  %v883_v39 = vadd.f32 %v827_v38, %v771_v53  ;;  %v830_v49 = vmul.f32 0.6931472, %v1563_v34  ;;  %v861_v53 = vand.u32 2147483647, %v2110_v55 }
 0x24b   : > { %v892_v45 = vmul.f32 %v2103_v24, %v882_v13  ;;  %v839_v46 = vmul.f32 0.6931472, %v1565_v19  ;;  %v777_v19 = vmax.f32 %v2075_v35, 0.0  ;;  %v920_v35 = vld [vmem:[%s2395_s5 + $0x10] sm:$0xff] }
 0x24c   : > { %v893_v6 = vmul.f32 %v2103_v24, %v883_v39  ;;  %v836_v43 = vsel %vm2130_vm12, %v833_v36, %v830_v49  ;;  %vm862_vm15 = vcmp.lt.f32.partialorder %v861_v53, 0.0004427343  ;;  %v934_v53 = vpop.permute.xlu1 %933 }
 0x24d   : > { %v1567_v59 = vpop.eup %1566  ;;  %v2148_v61 = vadd.f32 %v2084_v28, %v892_v45  ;;  %v884_v48 = vadd.f32 %v836_v43, %v772_v54  ;;  %v845_v62 = vsel %vm2134_vm13, %v842_v32, %v839_v46  ;;  %v860_v28 = vmul.f32 %v2110_v55, %v859_v56  ;;  %v918_v46 = vld [vmem:[%s2395_s5] sm:$0xff] }
 0x24e   : > { %v1569_v47 = vpop.eup %1568  ;;  %v885_v1 = vadd.f32 %v845_v62, %v773_v58  ;;  %v848_v3 = vmul.f32 0.6931472, %v1567_v59  ;;  %v2154_v2 = vadd.f32 %v2092_v29, %v893_v6 }
 0x24f   : > { %v894_v52 = vmul.f32 %v2103_v24, %v884_v48  ;;  %v857_v4 = vmul.f32 0.6931472, %v1569_v47  ;;  %v1571_v7 = vpop.eup %1570 }
 0x250   : > { %v895_v54 = vmul.f32 %v2103_v24, %v885_v1  ;;  %v854_v11 = vsel %vm853_vm14, %v851_v15, %v848_v3  ;;  %v873_v9 = vadd.f32 1.0, %v1571_v7  ;;  %v876_v31 = vmul.f32 -0.5, %v1571_v7 }
 0x251   : > { %v1573_v16 = vpop.eup %1572  ;;  %v2161_v58 = vadd.f32 %v2097_v50, %v894_v52  ;;  %v886_v29 = vadd.f32 %v854_v11, %v774_v51  ;;  %v863_v17 = vsel %vm862_vm15, %v860_v28, %v857_v4  ;;  %v879_v13 = vand.u32 2147483647, %v1571_v7 }
 0x252   : > { %v887_v18 = vadd.f32 %v863_v17, %v775_v57  ;;  %v866_v55 = vmul.f32 0.6931472, %v1573_v16  ;;  %1574 = vlog2.f32 %v873_v9  ;;  %v2170_v22 = vadd.f32 %v2101_v10, %v895_v54 }
 0x253   : > { %v896_v26 = vmul.f32 %v2103_v24, %v886_v29  ;;  %v1431_v50 = vpack.c.bf16 %v2161_v58, %v2148_v61  ;;  %v908_v10 = vmul.f32 %v2077_v25, %v2012_v23  ;;  %v877_v34 = vadd.f32 1.0, %v876_v31 }
 0x254   : > { %v897_v51 = vmul.f32 %v2103_v24, %v887_v18  ;;  %v872_v8 = vsel %vm871_vm0, %v869_v21, %v866_v55  ;;  %v1429_v30 = vpack.c.bf16 %v2170_v22, %v2154_v2  ;;  %vm880_vm1 = vcmp.lt.f32.partialorder %v879_v13, 0.0004427343  ;;  %v944_v18 = vpop.permute.xlu1 %943 }
 0x255   : > { %v2178_v57 = vadd.f32 %v2088_v41, %v896_v26  ;;  %v888_v63 = vadd.f32 %v872_v8, %v776_v14  ;;  %v878_v37 = vmul.f32 %v1571_v7, %v877_v34  ;;  %v909_v23 = vmul.f32 %v2077_v25, %v2030_v40  ;;  %v919_v40 = vld [vmem:[%s2395_s5 + $0x8] sm:$0xff]  ;;  %v921_v25 = vld [vmem:[%s2395_s5 + $0x18] sm:$0xff] }
 0x256   : > { %v2182_v12 = vadd.f32 %v907_v5, %v897_v51  ;;  %1430 = vmatprep.subr.bf16.mxu0 %v1429_v30 }
 0x257   : > { %v898_v33 = vmul.f32 %v2103_v24, %v888_v63  ;;  %1432 = vmatpush1.bf16.msra.mxu0 %v1431_v50 }
 0x259   : > { %v2187_v20 = vadd.f32 %v908_v10, %v898_v33 }
 0x25b   : > { %v1435_v41 = vpack.c.bf16 %v2187_v20, %v2178_v57 }
 0x25c   : > { %v1575_v38 = vpop.eup %1574 }
 0x25d   : > { %v875_v36 = vmul.f32 0.6931472, %v1575_v38 }
 0x25f   : > { %v881_v39 = vsel %vm880_vm1, %v878_v37, %v875_v36  ;;  %v2241_v36 = vstv %s1413_s30  ;;  %s1638_s30 = scalar_lea.vmem %s2350_s21, 32 }
 0x260   : > { %v889_v49 = vadd.f32 %v881_v39, %v777_v19  ;;  %p1639_p10 = scmp.ne.s32.totalorder %s2350_s21, %s1638_s30 }
 0x262   : > { %v899_v42 = vmul.f32 %v2103_v24, %v889_v49  ;;  %v929_v24 = vpop.permute.xlu0 %928  ;;  %p1640_p0 = pnand %p1639_p10, %p2441_p12 }
 0x264   : > { %v2195_v44 = vadd.f32 %v909_v23, %v899_v42  ;;  %v2248_v23 = vmul.f32 %v2241_v36, %v2148_v61  ;;  %v2263_v61 = vmul.f32 %v2241_v36, %v2178_v57  ;;  %p1641_p7 = pneg %p1640_p0 }
 0x266   : > { %v1433_v45 = vpack.c.bf16 %v2195_v44, %v2182_v12  ;;  %v939_v52 = vpop.permute.xlu0 %938 }
 0x268   : > { %1434 = vmatprep.subr.bf16.mxu0 %v1433_v45  ;;  %v2252_v45 = vmul.f32 %v2241_v36, %v2161_v58  ;;  %v2267_v58 = vmul.f32 %v2241_v36, %v2170_v22 }
 0x269   : > { %1436 = vmatpush1.bf16.msra.mxu0 %v1435_v41 }
 0x26c   : > { %1408 = vmatmul.mubr.msk.f32.vlgmr.msra.gmra.mrb[4].mxu0 %vm668_vm9, %v918_v46  ;;  %v2256_v46 = vmul.f32 %v2241_v36, %v2154_v2 }
 0x26d   : > { %1028 = vmatprep.mubr.f32.mxu0 %v1712_v0 }
 0x270   : > { %1409 = vmatmul.mubr.msk.f32.gmra.mrb[6].mxu0 %vm668_vm9, %v919_v40 }
 0x271   : > { %1034 = vmatprep.mubr.f32.mxu0 %v1712_v0 }
 0x274   : > { %1410 = vmatmul.mubr.msk.f32.gmra.mrb[8].mxu0 %vm668_vm9, %v920_v35 }
 0x275   : > { %1040 = vmatprep.mubr.f32.mxu0 %v1712_v0 }
 0x278   : > { %1411 = vmatmul.mubr.msk.f32.gmra.mrb[10].mxu0 %vm668_vm9, %v921_v25 }
 0x33f   : > { %v1024_v32 = vpop.f32.mrb[4].mxu0 }
 0x340   : > { %v2218_v56 = vadd.f32 %v1024_v32, %v929_v24  ;;  %v1026_v6 = vpop.f32.mrb[5].mxu0  ;;  %v2259_v32 = vstv %s1412_s27  ;;  %s1642_s27 = sshll.u32 %s1715_s17, 4  ;;  %s1643_s27 = int_to_ptr.vmem [resolvable:$false] %s1642_s27 }
 0x341   : > { %v2220_v43 = vadd.f32 %v1026_v6, %v929_v24  ;;  %s1644_s11 = scalar_lea.vmem %s1643_s27, 64  ;;  %p1645_p8 = scmp.lt.s32.totalorder %s2350_s21, %s1643_s27 }
 0x342   : > { %v1055_v15 = vand.u32 2147483647, %v2218_v56  ;;  %v1047_v2 = vmax.f32 %v2218_v56, 0.0  ;;  %p1646_p11 = scmp.lt.s32.totalorder %s1644_s11, %s1638_s30 }
 0x343   : > { %v1056_v59 = vand.u32 2147483647, %v2220_v43  ;;  %v1030_v48 = vpop.f32.mrb[6].mxu0 }
 0x344   : > { %v1063_v0 = vsub.f32 0.0, %v1055_v15  ;;  %v2224_v62 = vadd.f32 %v1030_v48, %v934_v53  ;;  %v1032_v27 = vpop.f32.mrb[7].mxu0  ;;  %v1048_v15 = vmax.f32 %v2220_v43, 0.0  ;;  %p1647_p13 = por %p1646_p11, %p1645_p8 }
 0x345   : > { %v1064_v47 = vsub.f32 0.0, %v1056_v59  ;;  %v2226_v1 = vadd.f32 %v1032_v27, %v934_v53 }
 0x346   : > { %v1071_v3 = vmul.f32 1.442695, %v1063_v0  ;;  %v1057_v60 = vand.u32 2147483647, %v2224_v62  ;;  %v1049_v53 = vmax.f32 %v2224_v62, 0.0  ;;  %p1648_p1 = pnand %p1647_p13, %p1641_p7 }
 0x347   : > { %v1073_v4 = vmul.f32 1.442695, %v1064_v47  ;;  %v1058_v28 = vand.u32 2147483647, %v2226_v1  ;;  %v1036_v7 = vpop.f32.mrb[8].mxu0  ;;  %v1050_v57 = vmax.f32 %v2226_v1, 0.0 }
 0x348   : > { %1576 = vpow2.f32 %v1071_v3  ;;  %v1065_v54 = vsub.f32 0.0, %v1057_v60  ;;  %v2230_v11 = vadd.f32 %v1036_v7, %v939_v52  ;;  %v1038_v14 = vpop.f32.mrb[9].mxu0 }
 0x349   : > { %1578 = vpow2.f32 %v1073_v4  ;;  %v1066_v16 = vsub.f32 0.0, %v1058_v28  ;;  %v2232_v29 = vadd.f32 %v1038_v14, %v939_v52 }
 0x34a   : > { %v1075_v17 = vmul.f32 1.442695, %v1065_v54  ;;  %v1059_v9 = vand.u32 2147483647, %v2230_v11  ;;  %v1051_v43 = vmax.f32 %v2230_v11, 0.0  ;;  %v1184_v11 = vmul.f32 %v2241_v36, %v2182_v12 }
 0x34b   : > { %v1077_v55 = vmul.f32 1.442695, %v1066_v16  ;;  %v1060_v21 = vand.u32 2147483647, %v2232_v29  ;;  %v1042_v26 = vpop.f32.mrb[10].mxu0  ;;  %v1052_v62 = vmax.f32 %v2232_v29, 0.0 }
 0x34c   : > { %1580 = vpow2.f32 %v1075_v17  ;;  %v1067_v50 = vsub.f32 0.0, %v1059_v9  ;;  %v2236_v5 = vadd.f32 %v1042_v26, %v944_v18  ;;  %v1044_v51 = vpop.f32.mrb[11].mxu0 }
 0x34d   : > { %1582 = vpow2.f32 %v1077_v55  ;;  %v1068_v8 = vsub.f32 0.0, %v1060_v21  ;;  %v2239_v33 = vadd.f32 %v1044_v51, %v944_v18 }
 0x34e   : > { %v1079_v63 = vmul.f32 1.442695, %v1067_v50  ;;  %v1061_v30 = vand.u32 2147483647, %v2236_v5 }
 0x34f   : > { %v1081_v31 = vmul.f32 1.442695, %v1068_v8  ;;  %v1062_v19 = vand.u32 2147483647, %v2239_v33 }
 0x350   : > { %1584 = vpow2.f32 %v1079_v63  ;;  %v1069_v10 = vsub.f32 0.0, %v1061_v30 }
 0x351   : > { %1586 = vpow2.f32 %v1081_v31  ;;  %v1070_v24 = vsub.f32 0.0, %v1062_v19 }
 0x352   : > { %v1577_v34 = vpop.eup %1576  ;;  %v1083_v13 = vmul.f32 1.442695, %v1069_v10 }
 0x353   : > { %v1579_v41 = vpop.eup %1578  ;;  %v1087_v38 = vadd.f32 1.0, %v1577_v34  ;;  %v1090_v40 = vmul.f32 -0.5, %v1577_v34  ;;  %v1093_v48 = vand.u32 2147483647, %v1577_v34  ;;  %v1085_v60 = vmul.f32 1.442695, %v1070_v24 }
 0x354   : > { %v1096_v37 = vadd.f32 1.0, %v1579_v41  ;;  %1588 = vpow2.f32 %v1083_v13  ;;  %v1099_v35 = vmul.f32 -0.5, %v1579_v41  ;;  %v1102_v4 = vand.u32 2147483647, %v1579_v41 }
 0x355   : > { %1590 = vlog2.f32 %v1087_v38  ;;  %v1091_v47 = vadd.f32 1.0, %v1090_v40  ;;  %vm2285_vm2 = vcmp.lt.f32.partialorder %v1093_v48, 0.0004427343 }
 0x356   : > { %v1581_v39 = vpop.eup %1580  ;;  %1592 = vlog2.f32 %v1096_v37  ;;  %v1100_v22 = vadd.f32 1.0, %v1099_v35  ;;  %vm1103_vm3 = vcmp.lt.f32.partialorder %v1102_v4, 0.0004427343 }
 0x357   : > { %v2244_v49 = vpop.eup %1582  ;;  %v1105_v42 = vadd.f32 1.0, %v1581_v39  ;;  %v1108_v0 = vmul.f32 -0.5, %v1581_v39  ;;  %v1111_v28 = vand.u32 2147483647, %v1581_v39  ;;  %v1092_v55 = vmul.f32 %v1577_v34, %v1091_v47 }
 0x358   : > { %v1114_v25 = vadd.f32 1.0, %v2244_v49  ;;  %v1117_v56 = vmul.f32 -0.5, %v2244_v49  ;;  %v1120_v16 = vand.u32 2147483647, %v2244_v49  ;;  %v1101_v21 = vmul.f32 %v1579_v41, %v1100_v22 }
 0x359   : > { %1594 = vlog2.f32 %v1105_v42  ;;  %v1109_v14 = vadd.f32 1.0, %v1108_v0  ;;  %vm2294_vm4 = vcmp.lt.f32.partialorder %v1111_v28, 0.0004427343 }
 0x35a   : > { %v2269_v6 = vpop.eup %1584  ;;  %1596 = vlog2.f32 %v1114_v25  ;;  %v1118_v50 = vadd.f32 1.0, %v1117_v56  ;;  %vm2298_vm5 = vcmp.lt.f32.partialorder %v1120_v16, 0.0004427343  ;;  %v1053_v16 = vmax.f32 %v2236_v5, 0.0 }
 0x35b   : > { %v2274_v59 = vpop.eup %1586  ;;  %v1123_v27 = vadd.f32 1.0, %v2269_v6  ;;  %v1126_v1 = vmul.f32 -0.5, %v2269_v6  ;;  %v1110_v34 = vmul.f32 %v1581_v39, %v1109_v14  ;;  %v1129_v42 = vand.u32 2147483647, %v2269_v6 }
 0x35c   : > { %v1132_v3 = vadd.f32 1.0, %v2274_v59  ;;  %v1135_v51 = vmul.f32 -0.5, %v2274_v59  ;;  %v1119_v24 = vmul.f32 %v2244_v49, %v1118_v50 }
 0x35d   : > { %1598 = vlog2.f32 %v1123_v27  ;;  %v1127_v30 = vadd.f32 1.0, %v1126_v1  ;;  %vm1130_vm6 = vcmp.lt.f32.partialorder %v1129_v42, 0.0004427343 }
 0x35e   : > { %v2282_v52 = vpop.eup %1588  ;;  %1600 = vlog2.f32 %v1132_v3  ;;  %v1136_v48 = vadd.f32 1.0, %v1135_v51 }
 0x35f   : > { %v1591_v7 = vpop.eup %1590  ;;  %v1141_v17 = vadd.f32 1.0, %v2282_v52  ;;  %1602 = vpow2.f32 %v1085_v60  ;;  %v1144_v40 = vmul.f32 -0.5, %v2282_v52  ;;  %v1128_v0 = vmul.f32 %v2269_v6, %v1127_v30 }
 0x360   : > { %v1593_v9 = vpop.eup %1592  ;;  %v1089_v18 = vmul.f32 0.6931472, %v1591_v7  ;;  %v1147_v60 = vand.u32 2147483647, %v2282_v52  ;;  %v1137_v54 = vmul.f32 %v2274_v59, %v1136_v48  ;;  %v1185_v30 = vmul.f32 %v2241_v36, %v2187_v20 }
 0x361   : > { %v1098_v26 = vmul.f32 0.6931472, %v1593_v9  ;;  %1604 = vlog2.f32 %v1141_v17  ;;  %v1145_v28 = vadd.f32 1.0, %v1144_v40  ;;  %v1186_v20 = vmul.f32 %v2241_v36, %v2195_v44 }
 0x362   : > { %v1095_v8 = vsel %vm2285_vm2, %v1092_v55, %v1089_v18  ;;  %vm1148_vm8 = vcmp.lt.f32.partialorder %v1147_v60, 0.0004427343 }
 0x363   : > { %v1595_v31 = vpop.eup %1594  ;;  %v1159_v10 = vadd.f32 %v1095_v8, %v1047_v2  ;;  %v1104_v13 = vsel %vm1103_vm3, %v1101_v21, %v1098_v26 }
 0x364   : > { %v1597_v38 = vpop.eup %1596  ;;  %v1160_v37 = vadd.f32 %v1104_v13, %v1048_v15  ;;  %v1107_v19 = vmul.f32 0.6931472, %v1595_v31  ;;  %v1138_v15 = vand.u32 2147483647, %v2274_v59  ;;  %v1146_v59 = vmul.f32 %v2282_v52, %v1145_v28 }
 0x365   : > { %v1169_v35 = vmul.f32 %v2259_v32, %v1159_v10  ;;  %v1116_v25 = vmul.f32 0.6931472, %v1597_v38 }
 0x366   : > { %v1170_v2 = vmul.f32 %v2259_v32, %v1160_v37  ;;  %v1113_v39 = vsel %vm2294_vm4, %v1110_v34, %v1107_v19  ;;  %vm1139_vm7 = vcmp.lt.f32.partialorder %v1138_v15, 0.0004427343 }
 0x367   : > { %v1599_v27 = vpop.eup %1598  ;;  %v1187_v47 = vadd.f32 %v2248_v23, %v1169_v35  ;;  %v1161_v22 = vadd.f32 %v1113_v39, %v1049_v53  ;;  %v1122_v3 = vsel %vm2298_vm5, %v1119_v24, %v1116_v25  ;;  %v1195_v35 = vld [vmem:[%s2397_s7] sm:$0x1]  ;;  %v1276_v24 = vlaneseq }
 0x368   : > { %v1601_v49 = vpop.eup %1600  ;;  %v1162_v56 = vadd.f32 %v1122_v3, %v1050_v57  ;;  %v1125_v4 = vmul.f32 0.6931472, %v1599_v27  ;;  %v1188_v1 = vadd.f32 %v2256_v46, %v1170_v2 }
 0x369   : > { %v1171_v7 = vmul.f32 %v2259_v32, %v1161_v22  ;;  %v1134_v6 = vmul.f32 0.6931472, %v1601_v49  ;;  %v1603_v14 = vpop.eup %1602  ;;  %vm1290_vm11 = vcmp.lt.s32.totalorder %v1276_v24, 256 }
 0x36a   : > { %v1172_v23 = vmul.f32 %v2259_v32, %v1162_v56  ;;  %v1131_v53 = vsel %vm1130_vm6, %v1128_v0, %v1125_v4  ;;  %v1150_v18 = vadd.f32 1.0, %v1603_v14  ;;  %v1153_v8 = vmul.f32 -0.5, %v1603_v14 }
 0x36b   : > { %v1605_v17 = vpop.eup %1604  ;;  %v1189_v57 = vadd.f32 %v2252_v45, %v1171_v7  ;;  %v1163_v9 = vadd.f32 %v1131_v53, %v1051_v43  ;;  %v1140_v46 = vsel %vm1139_vm7, %v1137_v54, %v1134_v6  ;;  %v1156_v10 = vand.u32 2147483647, %v1603_v14 }
 0x36c   : > { %v1164_v55 = vadd.f32 %v1140_v46, %v1052_v62  ;;  %v1143_v21 = vmul.f32 0.6931472, %v1605_v17  ;;  %1606 = vlog2.f32 %v1150_v18  ;;  %v1190_v5 = vadd.f32 %v2267_v58, %v1172_v23 }
 0x36d   : > { %v1173_v26 = vmul.f32 %v2259_v32, %v1163_v9  ;;  %v1439_v50 = vpack.c.bf16 %v1189_v57, %v1187_v47  ;;  %v1154_v31 = vadd.f32 1.0, %v1153_v8  ;;  %vm1157_vm10 = vcmp.lt.f32.partialorder %v1156_v10, 0.0004427343 }
 0x36e   : > { %v1174_v45 = vmul.f32 %v2259_v32, %v1164_v55  ;;  %v1149_v51 = vsel %vm1148_vm8, %v1146_v59, %v1143_v21  ;;  %v1437_v62 = vpack.c.bf16 %v1190_v5, %v1188_v1 }
 0x36f   : > { %v1191_v43 = vadd.f32 %v2263_v61, %v1173_v26  ;;  %v1165_v29 = vadd.f32 %v1149_v51, %v1053_v16  ;;  %v1155_v12 = vmul.f32 %v1603_v14, %v1154_v31  ;;  %v1054_v61 = vmax.f32 %v2239_v33, 0.0 }
 0x370   : > { %v1192_v63 = vadd.f32 %v1184_v11, %v1174_v45  ;;  %1438 = vmatprep.subr.bf16.mxu1 %v1437_v62  ;;  %v1714_v33 = vmov 1966171168  }
 0x371   : > { %v1175_v52 = vmul.f32 %v2259_v32, %v1165_v29  ;;  %1440 = vmatpush1.bf16.msra.mxu1 %v1439_v50  ;;  %v1274_v25 = vunpack.c.l.s4 %v1714_v33 }
 0x373   : > { %v1193_v58 = vadd.f32 %v1185_v30, %v1175_v52  ;;  %v1275_v48 = vunpack.c.0.s8 %v1274_v25 }
 0x375   : > { %v1443_v13 = vpack.c.bf16 %v1193_v58, %v1191_v43 }
 0x376   : > { %v1607_v34 = vpop.eup %1606 }
 0x377   : > { %v1152_v41 = vmul.f32 0.6931472, %v1607_v34 }
 0x379   : > { %v1158_v38 = vsel %vm1157_vm10, %v1155_v12, %v1152_v41 }
 0x37a   : > { %v1166_v37 = vadd.f32 %v1158_v38, %v1054_v61 }
 0x37c   : > { %v1176_v19 = vmul.f32 %v2259_v32, %v1166_v37  ;;  %v1277_v32 = vshrl.u32 %v1276_v24, 7 }
 0x37e   : > { %v1194_v42 = vadd.f32 %v1186_v20, %v1176_v19  ;;  %v1278_v44 = vsub.s32 %v1275_v48, %v1277_v32 }
 0x380   : > { %v1441_v40 = vpack.c.bf16 %v1194_v42, %v1192_v63 }
 0x382   : > { %1442 = vmatprep.subr.bf16.mxu1 %v1441_v40 }
 0x383   : > { %1444 = vmatpush1.bf16.msra.mxu1 %v1443_v13 }
 0x386   : > { %1414 = vmatmul.mubr.msk.f32.vlgmr.msra.gmra.mrb[12].mxu1 %vm668_vm9, %v1195_v35 }
 0x459   : > { %v1265_v2 = vpop.f32.mrb[12].mxu1 }
 0x45a   : > { %v1267_v36 = vpop.f32.mrb[13].mxu1 }
 0x45b   : > { %v1272_v39 = vcombine.low %v1265_v2, %v1267_v36 }
 0x45d   : > { %v1279_v0 = vrot.slane %v1272_v39, %v1278_v44 }
 0x45f   : > { %v1286_v15 = vrot.slane %v1279_v0, %v1278_v44 }
 0x461   : > { %1292 = vst.msk [vmem:[%s380_s20] sm:$0x3] %vm1290_vm11, %v1286_v15 }
 0x462   : > { %1651 = shalt.err (!%p1648_p1)
}
 0x463   : > { %s1652_s12 = scalar_lea.hbm %s2348_s28, 32  ;;  %s1656_s9 = scalar_lea.hbm %s2400_s10, 96 }
 0x464   : > { %p1653_p2 = scmp.ne.s32.totalorder %s2348_s28, %s1652_s12  ;;  %p1657_p9 = scmp.lt.u32.totalorder %s2348_s28, %s2400_s10 }
 0x465   : > { %p1658_p5 = scmp.lt.u32.totalorder %s1656_s9, %s1652_s12  ;;  %p1660_p10 = scmp.lt.u32.totalorder %s1652_s12, %s2348_s28 }
 0x466   : > { %p1654_p3 = pnand %p1653_p2, %p2441_p12 }
 0x467   : > { %p1659_p6 = por %p1658_p5, %p1657_p9 }
 0x468   : > { %p1655_p4 = pneg %p1654_p3 }
 0x469   : > { %p1661_p0 = por %p1660_p10, %p1659_p6 }
 0x46b   : > { %p1662_p7 = pnand %p1661_p0, %p1655_p4 }
 0x46d   : > { %1665 = shalt.err (!%p1662_p7)
}
 0x46e   : > { %1455 = dma.vmem_to_hbm [thread:$0]  (%p2441_p12), %s2350_s21, 32, %s2348_s28, %s1294_s29  }
 0x46f PF: > { %p1472_p8 = scmp.ge.s32.totalorder %s1708_s16, 2  ;;  %s1320_s25 = sand.u32 1, %s1696_s13  }
 0x470   : > { %p2442_p11 = scmp.ne.s32.totalorder %s2407_s24, 0  ;;  %s1321_s30 = scalar_lea.sflag [#allocation3], %s1320_s25 }
 0x472   : > { %p1465_p13 = pnand %p1472_p8, %p2442_p11 }
 0x474   : > { %1691 = dma.done.wait (!%p1465_p13), %s1321_s30, 32  }
 0x475   : > { %1693 = vsyncadd (!%p1465_p13), %s1321_s30, 4294967264  ;;  %p22_p1 = scmp.ge.s32.totalorder %s1796_s19, 5   ;;  %s2443_s13 = smov %s1700_s14 }
 0x476   : > { %s2444_s14 = smov %s1704_s15  ;;  %s2445_s15 = smov %s1807_s22 }
 0x477   : > { %s2446_s16 = smov %s1796_s19  ;;  %24 = sbr.rel (!%p22_p1) target bundleno = 8 (0x8), region = 104 }
 0x47e   :  { %1326 = vsyncpa [#allocation3], 1 }
 0x47f   :  { %1328 = vsyncpa [#allocation3 + $0x1], 1 }
 0x480   :  { %1329 = vsyncpa [#allocation4], 1 }
 0x481   :  { %1331 = vsyncpa [#allocation4 + $0x1], 1 }
 0x482   :  { %1332 = vsyncpa [#allocation6], 1 }

</bundles_post_ra>
